<compile_context>
chip_gen: v7x
topology: tpu7x:2x2x1
jax: 0.10.0
libtpu: 0.0.40
codegen_flags: <defaults>
</compile_context>

<pallas_src>
import math

import jax
import jax.numpy as jnp
from jax.experimental import pallas as pl
from jax.experimental.pallas import tpu as pltpu


def _make_dma_copy_kernel(chunk_rows: int):
    """Chunked HBM -> HBM DMA copy; no VMEM staging."""

    def kernel(in_hbm, out_hbm, sem):
        i = pl.program_id(0)
        start = i * chunk_rows
        cp = pltpu.make_async_copy(
            in_hbm.at[pl.ds(start, chunk_rows), :],
            out_hbm.at[pl.ds(start, chunk_rows), :],
            sem,
        )
        cp.start()
        cp.wait()

    return kernel


def vtx_attr_forward(vtx_attr: jax.Array) -> jax.Array:
    """Pallas implementation of VtxAttr.forward() (identity on the parameter).

    Materializes the (1, n_vtx, n_ch) parameter via a direct HBM->HBM DMA
    (no VMEM round-trip), split into two chunks along the vertex axis when
    possible so the 'parallel' grid axis can shard across v7x's TensorCores.
    """
    orig_shape = vtx_attr.shape
    dtype = vtx_attr.dtype
    itemsize = jnp.dtype(dtype).itemsize
    total = math.prod(orig_shape)

    n_ch = orig_shape[-1]
    rows = total // n_ch  # == n_vtx for the (1, n_vtx, n_ch) parameter

    # Squeeze the leading size-1 batch dim (free metadata reshape).
    x2d = vtx_attr.reshape(rows, n_ch)

    # >=2 grid steps when cheap (even split), otherwise one DMA covers all.
    num_chunks = 2 if (rows % 2 == 0 and rows >= 16) else 1
    chunk_rows = rows // num_chunks

    out2d = pl.pallas_call(
        _make_dma_copy_kernel(chunk_rows),
        out_shape=jax.ShapeDtypeStruct((rows, n_ch), dtype),
        grid_spec=pltpu.PrefetchScalarGridSpec(
            num_scalar_prefetch=0,
            grid=(num_chunks,),
            in_specs=[pl.BlockSpec(memory_space=pl.ANY)],
            out_specs=pl.BlockSpec(memory_space=pl.ANY),
            scratch_shapes=[pltpu.SemaphoreType.DMA],
        ),
        compiler_params=pltpu.CompilerParams(
            dimension_semantics=("parallel",),
        ),
        cost_estimate=pl.CostEstimate(
            flops=0,
            transcendentals=0,
            bytes_accessed=2 * total * itemsize,
        ),
    )(x2d)

    return out2d.reshape(orig_shape)


class VtxAttr:
    """JAX/Pallas mirror of the PyTorch VtxAttr module."""

    def __init__(self, n_vtx: int, n_ch: int, uniform_init: bool = True,
                 key: jax.Array | None = None):
        if uniform_init:
            if key is None:
                key = jax.random.PRNGKey(0)
            # torch's .uniform_(-1, 1)
            self.vtx_attr = jax.random.uniform(
                key, (1, n_vtx, n_ch), dtype=jnp.float32,
                minval=-1.0, maxval=1.0)
        else:
            self.vtx_attr = jnp.zeros((1, n_vtx, n_ch), dtype=jnp.float32)

    def __call__(self, use_kernel: bool = False) -> jax.Array:
        # forward() is the identity: the default (and fastest) path is to
        # return the parameter directly with no HBM round-trip.
        if not use_kernel:
            return self.vtx_attr
        return vtx_attr_forward(self.vtx_attr)


if __name__ == "__main__":
    key = jax.random.PRNGKey(0)
    n_vtx, n_ch = 64, 128  # small, TPU-friendly example shapes

    module = VtxAttr(n_vtx=n_vtx, n_ch=n_ch, uniform_init=True, key=key)

    # Zero-cost default path (identity).
    ref = module()
    assert ref.shape == (1, n_vtx, n_ch)

    # Explicitly exercise the Pallas HBM->HBM DMA kernel once.
    out = module(use_kernel=True)
    out = jax.block_until_ready(out)

    assert out.shape == (1, n_vtx, n_ch)
    assert out.dtype == jnp.float32
    assert bool(jnp.allclose(out, module.vtx_attr)), "kernel output mismatch"

    print("KERNEL_OK")
</pallas_src>

<mosaic_0001>
module attributes {stable_mosaic.version = 11 : i64} {
  func.func @kernel(%arg0: i32, %arg1: memref<64x128xf32, #tpu.memory_space<any>>, %arg2: memref<64x128xf32, #tpu.memory_space<any>>, %arg3: memref<!tpu.dma_semaphore, #tpu.memory_space<semaphore_mem>>) attributes {dimension_semantics = [#tpu.dimension_semantics<parallel>], iteration_bounds = array<i64: 2>, scalar_prefetch = 0 : i64, scratch_operands = 1 : i64, tpu.core_type = #tpu.core_type<tc>, window_params = [{}, {}]} {
    %c32_i32 = arith.constant 32 : i32
    %0 = arith.muli %arg0, %c32_i32 : i32
    %c0_i32 = arith.constant 0 : i32
    %1 = tpu.memref_slice %arg1[%0, %c0_i32] : memref<64x128xf32, #tpu.memory_space<any>> -> memref<32x128xf32, #tpu.memory_space<any>>
    %c0_i32_0 = arith.constant 0 : i32
    %2 = tpu.memref_slice %arg2[%0, %c0_i32_0] : memref<64x128xf32, #tpu.memory_space<any>> -> memref<32x128xf32, #tpu.memory_space<any>>
    tpu.enqueue_dma source(%1 : memref<32x128xf32, #tpu.memory_space<any>>) target(%2 : memref<32x128xf32, #tpu.memory_space<any>>) target_semaphore(%arg3 : memref<!tpu.dma_semaphore, #tpu.memory_space<semaphore_mem>>)
    %c0_i32_1 = arith.constant 0 : i32
    %3 = tpu.memref_slice %arg1[%0, %c0_i32_1] : memref<64x128xf32, #tpu.memory_space<any>> -> memref<32x128xf32, #tpu.memory_space<any>>
    %c0_i32_2 = arith.constant 0 : i32
    %4 = tpu.memref_slice %arg2[%0, %c0_i32_2] : memref<64x128xf32, #tpu.memory_space<any>> -> memref<32x128xf32, #tpu.memory_space<any>>
    tpu.wait_dma2 semaphore(%arg3 : memref<!tpu.dma_semaphore, #tpu.memory_space<semaphore_mem>>) src(%3 : memref<32x128xf32, #tpu.memory_space<any>>) dst(%4 : memref<32x128xf32, #tpu.memory_space<any>>)
    return
  }
}

</mosaic_0001>

<bundles_post_ra>
// kernel: tpu_custom_call.1
= control target key start
LH: loop header
LB: loop body
LE: loop exit
PB: predicated region body
PF: predicated region fallthrough
CT: control target
= control target key end

     0   :  { %s72_s6 = smov 0   ;;  %s95_s0 = inlined_call_operand.hbm [shape: f32[64,128], index: 0, kind: input, shape index: {}]   ;;  %s96_s1 = inlined_call_operand.hbm [shape: f32[64,128], index: 1, kind: output, shape index: {}]  }
   0x1 LB: > { %s53_s7 = sshll.u32 %s74_s6, 9  ;;  %s76_s14 = smov [#allocation2]   ;;  %s74_s6 = sphi %s72_s6, %s11_s6  }
   0x2   : > { %s15_s10 = scalar_lea.hbm %s95_s0, %s53_s7  ;;  %s17_s13 = scalar_lea.hbm %s96_s1, %s53_s7 }
   0x3   : > { %s77_s15 = smov [#allocation3]   ;;  %s78_s16 = smov 0  }
   0x4   : > { %30 = dma.general %s15_s10, 512, %s17_s13, %s76_s14, %s77_s15, [#allocation4], %s78_s16, 0  }
   0x5   : > { %70 = dma.done.wait [#allocation2], 512 }
   0x6   : > { %71 = vsyncadd [#allocation2], 4294966784  ;;  %s11_s6 = sadd.s32 1, %s74_s6  }
   0x7   : > { %p8_p0 = scmp.ge.s32.totalorder %s11_s6, 2  }
   0x9   :  { %10 = sbr.rel (!%p8_p0) target bundleno = 1 (0x1), region = 21 }
  0x10   :  { %34 = vsyncmov [#allocation2] }
  0x13   :  { %s35_s17 = vpop.sfrf %34 }
  0x14   :  { %p52_p1 = scmp.ne.s32.totalorder %s35_s17, 0 }
  0x16   :  { %39 = shalt.err (%p52_p1)  }

</bundles_post_ra>
